<compile_context>
chip_gen: v6e
topology: v6e:2x2x1
jax: 0.10.0
libtpu: 0.0.40
codegen_flags: <defaults>
</compile_context>

<pallas_src>
import functools

import jax
import jax.numpy as jnp
from jax.experimental import pallas as pl
from jax.experimental.pallas import tpu as pltpu

_MIB = 1 << 20
_VMEM_TARGET = 40 * _MIB            # conservative: below v7x's 64 MiB physical VMEM
_RESIDENT_WEIGHT_BUDGET = 20 * _MIB  # above this, switch to the hidden-tiled path


# ----------------------------------------------------------------------------
# Helpers
# ----------------------------------------------------------------------------
def _round_up(x, m):
    return (x + m - 1) // m * m


def _cdiv(a, b):
    return (a + b - 1) // b


def _lane_pad(d):
    # v6e/v7x MXUs are 256 wide: pad large lane dims to 256 so the systolic
    # array is fully fed; dims <= 128 stay at 128 (v5e MXU width, avoids 2x
    # padding waste on small layers).
    return _round_up(d, 256) if d > 128 else _round_up(d, 128)


def _resident_spec(block_shape, index_map):
    """BlockSpec for a block whose index never changes over the grid.

    Buffered(1) keeps a single VMEM copy (default pipelining would allocate a
    double buffer for the weights even though the block is constant).  Falls
    back to a plain BlockSpec if this Pallas version rejects pipeline_mode.
    """
    try:
        return pl.BlockSpec(block_shape, index_map, pipeline_mode=pl.Buffered(1))
    except Exception:  # pragma: no cover - older Pallas versions
        return pl.BlockSpec(block_shape, index_map)


# ----------------------------------------------------------------------------
# Kernels
# ----------------------------------------------------------------------------
def _mlp_kernel_resident(x_ref, w1_ref, b1_ref, w2_ref, b2_ref, o_ref):
    # Weights fully VMEM-resident; the hidden activation never leaves VMEM.
    x = x_ref[...].astype(w1_ref.dtype)  # bf16 (or f32) MXU operands
    h = jnp.dot(x, w1_ref[...], preferred_element_type=jnp.float32) + b1_ref[...]
    h = jnp.maximum(h, 0.0)
    o_ref[...] = (
        jnp.dot(h.astype(w2_ref.dtype), w2_ref[...],
                preferred_element_type=jnp.float32)
        + b2_ref[...]
    )


def _mlp_kernel_htiled(x_ref, w1_ref, b1_ref, w2_ref, b2_ref, o_ref, acc_ref):
    # Hidden dimension tiled: grid axis 1 is the reduction ("arbitrary") axis.
    # Exact split: ReLU is per-hidden-unit, so hidden tiles are independent and
    # the second matmul's partial products accumulate in an f32 VMEM scratch.
    j = pl.program_id(1)

    @pl.when(j == 0)
    def _():
        acc_ref[...] = jnp.zeros_like(acc_ref)

    x = x_ref[...].astype(w1_ref.dtype)
    h = jnp.dot(x, w1_ref[...], preferred_element_type=jnp.float32) + b1_ref[...]
    h = jnp.maximum(h, 0.0)
    acc_ref[...] += jnp.dot(h.astype(w2_ref.dtype), w2_ref[...],
                            preferred_element_type=jnp.float32)

    @pl.when(j == pl.num_programs(1) - 1)
    def _():
        o_ref[...] = acc_ref[...] + b2_ref[...]


# ----------------------------------------------------------------------------
# Wrapper
# ----------------------------------------------------------------------------
def prepare_params(w1, b1, w2, b2, *, use_bf16_matmul=True):
    """Pad (and optionally pre-cast to bf16) the MLP parameters ONCE.

    Returns (padded_params, dims); dims = (input_size, hidden_size, output_size)
    must be passed (as a static python tuple) to mlp_forward.
    """
    d_in, h = w1.shape
    h2, o = w2.shape
    assert h2 == h
    d_in_p, h_p, o_p = _lane_pad(d_in), _lane_pad(h), _lane_pad(o)
    wdt = jnp.bfloat16 if use_bf16_matmul else jnp.float32

    w1p = jnp.zeros((d_in_p, h_p), wdt).at[:d_in, :h].set(w1.astype(wdt))
    b1p = jnp.zeros((1, h_p), jnp.float32).at[0, :h].set(b1.astype(jnp.float32))
    w2p = jnp.zeros((h_p, o_p), wdt).at[:h, :o].set(w2.astype(wdt))
    b2p = jnp.zeros((1, o_p), jnp.float32).at[0, :o].set(b2.astype(jnp.float32))
    return (w1p, b1p, w2p, b2p), (int(d_in), int(h), int(o))


@functools.partial(jax.jit, static_argnames=("dims",))
def mlp_forward(x, w1p, b1p, w2p, b2p, dims):
    """Fused Linear -> ReLU -> Linear on pre-padded params (see prepare_params)."""
    d_in, h, o = dims
    d_in_p, h_p = w1p.shape
    o_p = w2p.shape[1]
    wt_bytes = w1p.dtype.itemsize
    x_bytes = x.dtype.itemsize

    lead = x.shape[:-1]
    assert x.shape[-1] == d_in
    x2 = x.reshape(-1, d_in)
    n = x2.shape[0]

    # ---- row tiling (VMEM budget includes the in-VMEM hidden temporary) -----
    n8 = _round_up(max(n, 1), 8)
    resident_bytes = (d_in_p * h_p + h_p * o_p) * wt_bytes + (h_p + o_p) * 4
    # per-row bytes: 2x x-tile (double buffered) + 2x out-tile + f32 hidden temp
    # + f32 accumulator (fallback path; counted conservatively for both paths).
    per_row = 2 * d_in_p * x_bytes + 2 * o_p * 4 + h_p * 4 + o_p * 4
    tile_budget = max(4 * _MIB, _VMEM_TARGET - 2 * resident_bytes)
    tr_cap = max(8, min(1024, (tile_budget // per_row) // 8 * 8))
    # >= 2 row blocks when possible so the "parallel" axis shards across both
    # v7x TensorCores (one extra ~0.35us grid step on single-TC v5e/v6e).
    min_blocks = 2 if n8 >= 16 else 1
    n_blocks = max(_cdiv(n8, tr_cap), min_blocks)
    tr = _round_up(_cdiv(n8, n_blocks), 8)   # balanced tiles, no 512-overshoot
    n_pad = tr * n_blocks

    # ---- pad x only when actually needed ------------------------------------
    if n_pad != n or d_in_p != d_in:
        xp = jnp.zeros((n_pad, d_in_p), x2.dtype).at[:n, :d_in].set(x2)
    else:
        xp = x2

    flops = 2 * n_pad * d_in_p * h_p + 2 * n_pad * h_p * o_p
    bytes_accessed = (
        n_pad * d_in_p * x_bytes
        + (d_in_p * h_p + h_p * o_p) * wt_bytes
        + (h_p + o_p) * 4
        + n_pad * o_p * 4
    )
    vmem_limit = int(
        min(64 * _MIB, max(32 * _MIB, 2 * resident_bytes + tr * per_row + 2 * _MIB))
    )
    cost = pl.CostEstimate(flops=flops, transcendentals=0,
                           bytes_accessed=bytes_accessed)

    if resident_bytes <= _RESIDENT_WEIGHT_BUDGET:
        # -------- fully-resident weights, grid over rows only ----------------
        out_p = pl.pallas_call(
            _mlp_kernel_resident,
            out_shape=jax.ShapeDtypeStruct((n_pad, o_p), jnp.float32),
            grid_spec=pltpu.PrefetchScalarGridSpec(
                num_scalar_prefetch=0,
                grid=(n_blocks,),
                in_specs=[
                    pl.BlockSpec((tr, d_in_p), lambda i: (i, 0)),        # x tile
                    _resident_spec((d_in_p, h_p), lambda i: (0, 0)),     # w1
                    _resident_spec((1, h_p), lambda i: (0, 0)),          # b1
                    _resident_spec((h_p, o_p), lambda i: (0, 0)),        # w2
                    _resident_spec((1, o_p), lambda i: (0, 0)),          # b2
                ],
                out_specs=pl.BlockSpec((tr, o_p), lambda i: (i, 0)),
            ),
            compiler_params=pltpu.CompilerParams(
                dimension_semantics=("parallel",),
                vmem_limit_bytes=vmem_limit,
            ),
            cost_estimate=cost,
        )(xp, w1p, b1p, w2p, b2p)
    else:
        # -------- weights too big to hold resident: tile the hidden dim ------
        if h_p % 256 == 0:
            th_cap = max(
                256,
                (_RESIDENT_WEIGHT_BUDGET // ((d_in_p + o_p) * wt_bytes)) // 256 * 256,
            )
            th = min(th_cap, h_p)
            while h_p % th != 0:
                th -= 256
        else:
            th = h_p
        h_blocks = h_p // th
        # TODO(synk): also tile d_in / output lane dims if a single (d_in_p, th)
        # or (th, o_p) weight slab itself no longer fits in VMEM.

        out_p = pl.pallas_call(
            _mlp_kernel_htiled,
            out_shape=jax.ShapeDtypeStruct((n_pad, o_p), jnp.float32),
            grid_spec=pltpu.PrefetchScalarGridSpec(
                num_scalar_prefetch=0,
                grid=(n_blocks, h_blocks),
                in_specs=[
                    pl.BlockSpec((tr, d_in_p), lambda i, j: (i, 0)),     # x tile
                    pl.BlockSpec((d_in_p, th), lambda i, j: (0, j)),     # w1 h-tile
                    pl.BlockSpec((1, th), lambda i, j: (0, j)),          # b1 h-tile
                    pl.BlockSpec((th, o_p), lambda i, j: (j, 0)),        # w2 h-tile
                    _resident_spec((1, o_p), lambda i, j: (0, 0)),       # b2
                ],
                out_specs=pl.BlockSpec((tr, o_p), lambda i, j: (i, 0)),
                scratch_shapes=[pltpu.VMEM((tr, o_p), jnp.float32)],
            ),
            compiler_params=pltpu.CompilerParams(
                dimension_semantics=("parallel", "arbitrary"),
                vmem_limit_bytes=vmem_limit,
            ),
            cost_estimate=cost,
        )(xp, w1p, b1p, w2p, b2p)

    out = out_p
    if n_pad != n or o_p != o:
        out = out[:n, :o]
    return out.reshape(*lead, o)


def init_params(key, input_size, hidden_size, output_size):
    """PyTorch nn.Linear-style init: U(-1/sqrt(fan_in), +1/sqrt(fan_in))."""
    k1, k2, k3, k4 = jax.random.split(key, 4)

    def lin(kw, kb, fan_in, fan_out):
        bound = 1.0 / jnp.sqrt(jnp.float32(fan_in))
        w = jax.random.uniform(kw, (fan_in, fan_out), jnp.float32, -bound, bound)
        b = jax.random.uniform(kb, (fan_out,), jnp.float32, -bound, bound)
        return w, b

    w1, b1 = lin(k1, k2, input_size, hidden_size)
    w2, b2 = lin(k3, k4, hidden_size, output_size)
    return w1, b1, w2, b2


if __name__ == "__main__":
    # Small shapes consistent with the module's forward pass.
    batch = 2
    input_size = 32
    hidden_size = 64
    output_size = 10

    key = jax.random.PRNGKey(0)
    kx, kp = jax.random.split(key)
    x = jax.random.normal(kx, (batch, input_size), jnp.float32)
    w1, b1, w2, b2 = init_params(kp, input_size, hidden_size, output_size)

    # Plain-JAX reference (f32).
    ref = jnp.maximum(x @ w1 + b1, 0.0) @ w2 + b2

    # Default path: bf16 MXU operands, f32 accumulation / bias / ReLU.
    (pw1, pb1, pw2, pb2), dims = prepare_params(w1, b1, w2, b2, use_bf16_matmul=True)
    out_bf16 = jax.block_until_ready(mlp_forward(x, pw1, pb1, pw2, pb2, dims))
    assert out_bf16.shape == (batch, output_size)
    assert jnp.allclose(out_bf16, ref, atol=5e-2, rtol=5e-2)  # bf16 rounding tolerance

    # Bit-careful f32 path, tight check.
    (fw1, fb1, fw2, fb2), dims_f = prepare_params(w1, b1, w2, b2, use_bf16_matmul=False)
    out_f32 = jax.block_until_ready(mlp_forward(x, fw1, fb1, fw2, fb2, dims_f))
    assert jnp.allclose(out_f32, ref, atol=1e-4, rtol=1e-4)

    print("KERNEL_OK")
</pallas_src>

<mosaic_0001>
module attributes {stable_mosaic.version = 11 : i64} {
  func.func @_mlp_kernel_resident(%arg0: i32, %arg1: memref<8x128xf32, #tpu.memory_space<vmem>>, %arg2: memref<128x128xbf16, #tpu.memory_space<vmem>>, %arg3: memref<1x128xf32, #tpu.memory_space<vmem>>, %arg4: memref<128x128xbf16, #tpu.memory_space<vmem>>, %arg5: memref<1x128xf32, #tpu.memory_space<vmem>>, %arg6: memref<8x128xf32, #tpu.memory_space<vmem>>) attributes {dimension_semantics = [#tpu.dimension_semantics<parallel>], iteration_bounds = array<i64: 1>, scalar_prefetch = 0 : i64, scratch_operands = 0 : i64, tpu.core_type = #tpu.core_type<tc>, window_params = [{transform_indices = @transform_0, window_bounds = array<i64: 8, 128>}, {pipeline_mode = #tpu.pipeline_mode<synchronous>, transform_indices = @transform_1, window_bounds = array<i64: 128, 128>}, {pipeline_mode = #tpu.pipeline_mode<synchronous>, transform_indices = @transform_2, window_bounds = array<i64: 1, 128>}, {pipeline_mode = #tpu.pipeline_mode<synchronous>, transform_indices = @transform_3, window_bounds = array<i64: 128, 128>}, {pipeline_mode = #tpu.pipeline_mode<synchronous>, transform_indices = @transform_4, window_bounds = array<i64: 1, 128>}, {transform_indices = @transform_5, window_bounds = array<i64: 8, 128>}]} {
    %c0 = arith.constant 0 : index
    %c0_0 = arith.constant 0 : index
    %0 = vector.load %arg1[%c0, %c0_0] : memref<8x128xf32, #tpu.memory_space<vmem>>, vector<8x128xf32>
    %1 = arith.truncf %0 : vector<8x128xf32> to vector<8x128xbf16>
    %c0_1 = arith.constant 0 : index
    %c0_2 = arith.constant 0 : index
    %2 = vector.load %arg2[%c0_1, %c0_2] : memref<128x128xbf16, #tpu.memory_space<vmem>>, vector<128x128xbf16>
    %cst = arith.constant dense<0.000000e+00> : vector<8x128xf32>
    %3 = tpu.matmul %1, %2, %cst {dimension_numbers = #tpu.dot_dimension_numbers<[1], [0], [0], [1], [0, 0, 1, 1], [], []>} : vector<8x128xbf16>, vector<128x128xbf16>, vector<8x128xf32> -> vector<8x128xf32>
    %c0_3 = arith.constant 0 : index
    %c0_4 = arith.constant 0 : index
    %4 = vector.load %arg3[%c0_3, %c0_4] : memref<1x128xf32, #tpu.memory_space<vmem>>, vector<1x128xf32>
    %5 = vector.broadcast %4 : vector<1x128xf32> to vector<8x128xf32>
    %6 = arith.addf %3, %5 : vector<8x128xf32>
    %cst_5 = arith.constant 0.000000e+00 : f32
    %7 = vector.broadcast %cst_5 : f32 to vector<8x128xf32>
    %8 = arith.maximumf %6, %7 : vector<8x128xf32>
    %9 = arith.truncf %8 : vector<8x128xf32> to vector<8x128xbf16>
    %c0_6 = arith.constant 0 : index
    %c0_7 = arith.constant 0 : index
    %10 = vector.load %arg4[%c0_6, %c0_7] : memref<128x128xbf16, #tpu.memory_space<vmem>>, vector<128x128xbf16>
    %cst_8 = arith.constant dense<0.000000e+00> : vector<8x128xf32>
    %11 = tpu.matmul %9, %10, %cst_8 {dimension_numbers = #tpu.dot_dimension_numbers<[1], [0], [0], [1], [0, 0, 1, 1], [], []>} : vector<8x128xbf16>, vector<128x128xbf16>, vector<8x128xf32> -> vector<8x128xf32>
    %c0_9 = arith.constant 0 : index
    %c0_10 = arith.constant 0 : index
    %12 = vector.load %arg5[%c0_9, %c0_10] : memref<1x128xf32, #tpu.memory_space<vmem>>, vector<1x128xf32>
    %13 = vector.broadcast %12 : vector<1x128xf32> to vector<8x128xf32>
    %14 = arith.addf %11, %13 : vector<8x128xf32>
    %c0_11 = arith.constant 0 : index
    %c0_12 = arith.constant 0 : index
    %15 = vector.load %arg6[%c0_11, %c0_12] : memref<8x128xf32, #tpu.memory_space<vmem>>, vector<8x128xf32>
    tpu.vector_store %arg6[%c0_11, %c0_12], %14 {strides = array<i32>} : memref<8x128xf32, #tpu.memory_space<vmem>>, vector<8x128xf32>,
    return
  }
  func.func @transform_0(%arg0: i32) -> (i32, i32) {
    %c0_i32 = arith.constant 0 : i32
    %c0_i32_0 = arith.constant 0 : i32
    return %arg0, %c0_i32 : i32, i32
  }
  func.func @transform_1(%arg0: i32) -> (i32, i32) {
    %c0_i32 = arith.constant 0 : i32
    %c0_i32_0 = arith.constant 0 : i32
    %c0_i32_1 = arith.constant 0 : i32
    return %c0_i32, %c0_i32_0 : i32, i32
  }
  func.func @transform_2(%arg0: i32) -> (i32, i32) {
    %c0_i32 = arith.constant 0 : i32
    %c0_i32_0 = arith.constant 0 : i32
    %c0_i32_1 = arith.constant 0 : i32
    return %c0_i32, %c0_i32_0 : i32, i32
  }
  func.func @transform_3(%arg0: i32) -> (i32, i32) {
    %c0_i32 = arith.constant 0 : i32
    %c0_i32_0 = arith.constant 0 : i32
    %c0_i32_1 = arith.constant 0 : i32
    return %c0_i32, %c0_i32_0 : i32, i32
  }
  func.func @transform_4(%arg0: i32) -> (i32, i32) {
    %c0_i32 = arith.constant 0 : i32
    %c0_i32_0 = arith.constant 0 : i32
    %c0_i32_1 = arith.constant 0 : i32
    return %c0_i32, %c0_i32_0 : i32, i32
  }
  func.func @transform_5(%arg0: i32) -> (i32, i32) {
    %c0_i32 = arith.constant 0 : i32
    %c0_i32_0 = arith.constant 0 : i32
    return %arg0, %c0_i32 : i32, i32
  }
}

</mosaic_0001>

<bundles_post_ra>
// kernel: mlp_forward.1
= control target key start
LH: loop header
LB: loop body
LE: loop exit
PB: predicated region body
PF: predicated region fallthrough
CT: control target
= control target key end

     0   :  { %10 = vsyncpa [#allocation3], 0  ;;  %s478_s0 = inlined_call_operand.vmem [shape: f32[8,128], index: 0, kind: input, shape index: {}]   ;;  %s479_s1 = inlined_call_operand.hbm [shape: bf16[128,128], index: 1, kind: input, shape index: {}]   ;;  %s480_s2 = inlined_call_operand.vmem [shape: f32[1,128], index: 2, kind: input, shape index: {}]   ;;  %s481_s3 = inlined_call_operand.hbm [shape: bf16[128,128], index: 3, kind: input, shape index: {}]   ;;  %s482_s4 = inlined_call_operand.vmem [shape: f32[1,128], index: 4, kind: input, shape index: {}]   ;;  %s483_s5 = inlined_call_operand.vmem [shape: f32[8,128], index: 5, kind: output, shape index: {}]  }
   0x1   :  { %11 = vsyncpa [#allocation5], 0  ;;  %s424_s18 = smov [#allocation2]  }
   0x2   :  { %s19_s19 = sshll.u32 %s424_s18, 4  ;;  %s20_s19 = int_to_ptr.vmem [resolvable:$true] %s19_s19 }
   0x3   :  { %s388_s20 = scalar_lea.vmem %s20_s19, 1024  ;;  %p393_p1 = scmp.lt.s32.totalorder %s20_s19, %s20_s19 }
   0x4   :  { %p389_p0 = scmp.ne.s32.totalorder %s20_s19, %s388_s20  ;;  %p394_p2 = scmp.lt.s32.totalorder %s388_s20, %s388_s20 }
   0x6   :  { %p395_p3 = por %p394_p2, %p393_p1 }
   0x8   :  { %p396_p4 = pnand %p395_p3, %p389_p0 }
   0xa   :  { %399 = shalt.err (!%p396_p4)
}
   0xb   :  { %s425_s21 = smov 64   ;;  %s426_s22 = smov 4  }
   0xc   :  { %25 = dma.hbm_to_vmem [thread:$0]  %s479_s1, 1024, %s20_s19, [#allocation3], %s425_s21, %s425_s21, %s426_s22  }
   0xd   :  { %s427_s25 = smov [#allocation4]  }
   0xe   :  { %s33_s26 = sshll.u32 %s427_s25, 4  ;;  %s34_s26 = int_to_ptr.vmem [resolvable:$true] %s33_s26 }
   0xf   :  { %s408_s27 = scalar_lea.vmem %s34_s26, 1024  ;;  %p413_p6 = scmp.lt.s32.totalorder %s34_s26, %s34_s26 }
  0x10   :  { %p409_p5 = scmp.ne.s32.totalorder %s34_s26, %s408_s27  ;;  %p414_p7 = scmp.lt.s32.totalorder %s408_s27, %s408_s27 }
  0x12   :  { %p415_p8 = por %p414_p7, %p413_p6 }
  0x14   :  { %p416_p9 = pnand %p415_p8, %p409_p5 }
  0x16   :  { %419 = shalt.err (!%p416_p9)
}
  0x17   :  { %39 = dma.hbm_to_vmem [thread:$0]  %s481_s3, 1024, %s34_s26, [#allocation5], %s425_s21, %s425_s21, %s426_s22  }
  0x18   :  { %420 = dma.done.wait [#allocation3], 1024  }
  0x19   :  { %421 = vsyncadd [#allocation3], 4294966272 }
  0x1a   :  { %422 = dma.done.wait [#allocation5], 1024  }
  0x1b   :  { %423 = vsyncadd [#allocation5], 4294966272  ;;  %v428_v0 = vmov 0.0   ;;  %vm429_vm0 = vmmov 0   ;;  %v364_v1 = vld [vmem:[#allocation2 + $0x38] sm:$0xff]   ;;  %v365_v2 = vld [vmem:[#allocation2 + $0x30] sm:$0xff]  }
  0x1c   :  { %318 = vmatprep.subr.bf16.mxu0 %v428_v0  ;;  %334 = vmatprep.mubr.msk.bf16.mxu0 %vm429_vm0, %v428_v0  ;;  %v366_v3 = vld [vmem:[#allocation2 + $0x28] sm:$0xff]   ;;  %v372_v4 = vld [vmem:[#allocation4 + $0x38] sm:$0xff]   ;;  %v367_v5 = vld [vmem:[#allocation2 + $0x20] sm:$0xff]  }
  0x1d   :  { %338 = vmatprep.subr.bf16.mxu1 %v428_v0  ;;  %354 = vmatprep.mubr.msk.bf16.mxu1 %vm429_vm0, %v428_v0  ;;  %v373_v6 = vld [vmem:[#allocation4 + $0x30] sm:$0xff]   ;;  %v368_v7 = vld [vmem:[#allocation2 + $0x18] sm:$0xff]   ;;  %v374_v8 = vld [vmem:[#allocation4 + $0x28] sm:$0xff]  }
  0x1e   :  { %319 = vmatpush3.bf16.msra.mxu0 %v364_v1  ;;  %339 = vmatpush3.bf16.msra.mxu1 %v372_v4  ;;  %v369_v9 = vld [vmem:[#allocation2 + $0x10] sm:$0xff]   ;;  %v375_v10 = vld [vmem:[#allocation4 + $0x20] sm:$0xff]   ;;  %v370_v11 = vld [vmem:[#allocation2 + $0x8] sm:$0xff]  }
  0x1f   :  { %320 = vmatprep.subr.bf16.mxu0 %v428_v0  ;;  %340 = vmatprep.subr.bf16.mxu1 %v428_v0  ;;  %v376_v12 = vld [vmem:[#allocation4 + $0x18] sm:$0xff]   ;;  %v371_v13 = vld [vmem:[#allocation2] sm:$0xff]   ;;  %v377_v15 = vld [vmem:[#allocation4 + $0x10] sm:$0xff]  }
  0x20   :  { %v49_v14 = vld [vmem:[%s478_s0] sm:$0xff]  ;;  %v378_v17 = vld [vmem:[#allocation4 + $0x8] sm:$0xff]  }
  0x21   :  { %v50_v16 = vpack.c.bf16 %v49_v14, %v49_v14  ;;  %v379_v18 = vld [vmem:[#allocation4] sm:$0xff]  }
  0x22   :  { %321 = vmatpush3.bf16.msra.mxu0 %v365_v2  ;;  %341 = vmatpush3.bf16.msra.mxu1 %v373_v6  ;;  %v282_v19 = vld [vmem:[%s480_s2] ss:$0 sm:$0xff] }
  0x23   :  { %322 = vmatprep.subr.bf16.mxu0 %v428_v0  ;;  %342 = vmatprep.subr.bf16.mxu1 %v428_v0  ;;  %v291_v27 = vld [vmem:[%s482_s4] ss:$0 sm:$0xff] }
  0x26   :  { %323 = vmatpush3.bf16.msra.mxu0 %v366_v3  ;;  %343 = vmatpush3.bf16.msra.mxu1 %v374_v8 }
  0x27   :  { %324 = vmatprep.subr.bf16.mxu0 %v428_v0  ;;  %344 = vmatprep.subr.bf16.mxu1 %v428_v0 }
  0x2a   :  { %325 = vmatpush3.bf16.msra.mxu0 %v367_v5  ;;  %345 = vmatpush3.bf16.msra.mxu1 %v375_v10 }
  0x2b   :  { %326 = vmatprep.subr.bf16.mxu0 %v428_v0  ;;  %346 = vmatprep.subr.bf16.mxu1 %v428_v0 }
  0x2e   :  { %327 = vmatpush3.bf16.msra.mxu0 %v368_v7  ;;  %347 = vmatpush3.bf16.msra.mxu1 %v376_v12 }
  0x2f   :  { %328 = vmatprep.subr.bf16.mxu0 %v428_v0  ;;  %348 = vmatprep.subr.bf16.mxu1 %v428_v0 }
  0x32   :  { %329 = vmatpush3.bf16.msra.mxu0 %v369_v9  ;;  %349 = vmatpush3.bf16.msra.mxu1 %v377_v15 }
  0x33   :  { %330 = vmatprep.subr.bf16.mxu0 %v428_v0  ;;  %350 = vmatprep.subr.bf16.mxu1 %v428_v0 }
  0x36   :  { %331 = vmatpush3.bf16.msra.mxu0 %v370_v11  ;;  %351 = vmatpush3.bf16.msra.mxu1 %v378_v17 }
  0x37   :  { %332 = vmatprep.subr.bf16.mxu0 %v428_v0  ;;  %352 = vmatprep.subr.bf16.mxu1 %v428_v0 }
  0x3a   :  { %333 = vmatpush3.bf16.msra.mxu0 %v371_v13  ;;  %353 = vmatpush3.bf16.msra.mxu1 %v379_v18 }
  0x3d   :  { %335 = vmatmul.mubr.bf16.vlgmr.msra.gmra.mxu0 %v50_v16 }
  0xfd   :  { %v156_v20 = vpop.f32.mrf.mxu0 }
  0xfe   :  { %v157_v21 = vadd.f32 %v282_v19, %v156_v20 }
  0xff   :  { %v336_v22 = vpop.f32.mrf.mxu0 }
 0x100   :  { %v162_v23 = vmax.f32 %v157_v21, 0.0 }
 0x101   :  { %v159_v24 = vpop.f32.mrf.mxu0 }
 0x102   :  { %v163_v25 = vpack.c.bf16 %v162_v23, %v162_v23 }
 0x103   :  { %v337_v26 = vpop.f32.mrf.mxu0 }
 0x104   :  { %355 = vmatmul.mubr.bf16.vlgmr.msra.gmra.mxu1 %v163_v25 }
 0x1c4   :  { %v269_v28 = vpop.f32.mrf.mxu1 }
 0x1c5   :  { %v270_v29 = vadd.f32 %v291_v27, %v269_v28 }
 0x1c6   :  { %v356_v30 = vpop.f32.mrf.mxu1 }
 0x1c7   :  { %275 = vst [vmem:[%s483_s5] sm:$0xff] %v270_v29 }
 0x1c8   :  { %v272_v31 = vpop.f32.mrf.mxu1 }
 0x1ca   :  { %v357_v32 = vpop.f32.mrf.mxu1 }
 0x1cb   :  { %280 = vsyncpa [#allocation3], 1 }
 0x1cc   :  { %281 = vsyncpa [#allocation5], 1 }

</bundles_post_ra>
